<compile_context>
chip_gen: v7x
topology: tpu7x:2x2x1
jax: 0.10.0
libtpu: 0.0.40
codegen_flags: <defaults>
</compile_context>

<pallas_src>
import functools
import math

import jax
import jax.numpy as jnp
from jax.experimental import pallas as pl
from jax.experimental.pallas import tpu as pltpu


def pretrained_kernel(pat_ref, w1_ref, b1_ref, w2t_ref, b2t_ref, o_ref, *, N, Q, K):
    """Whole batch in one grid step.

    pat_ref : (4*N*Q, 9*Cin)  im2col patches; row = (tap*N + n)*Q + q, where
                              tap = hb*2 + wb is the 2x2 pool-window position
                              and q = hp*Wp + wp is the pooled spatial index.
    w1_ref  : (9*Cin, F)      features conv weight, (kh, kw, cin) flattened
    b1_ref  : (1, F)          features conv bias
    w2t_ref : (K, F)          predict 1x1 conv weight, transposed
    b2t_ref : (K, 1)          predict bias (column vector)
    o_ref   : (N, K*Q)        NCHW-order flattened class scores
    """
    # --- 3x3 conv (pad=1) as a single MXU matmul, bias + ReLU fused ---
    feat = jnp.maximum(
        jnp.dot(pat_ref[...], w1_ref[...], preferred_element_type=jnp.float32)
        + b1_ref[...],
        0.0)                                                   # (4*N*Q, F)

    # --- MaxPool2d(2): rows are grouped by pool tap, so pooling is an
    #     elementwise max over four aligned row blocks (VPU only) ---
    M = N * Q
    p = jnp.maximum(jnp.maximum(feat[0 * M:1 * M], feat[1 * M:2 * M]),
                    jnp.maximum(feat[2 * M:3 * M], feat[3 * M:4 * M]))  # (N*Q, F)

    # --- predict: 1x1 conv == (K,F) @ (N*Q,F)^T -> (K, N*Q); spatial on lanes ---
    pred = jax.lax.dot_general(
        w2t_ref[...], p, (((1,), (1,)), ((), ())),
        preferred_element_type=jnp.float32) + b2t_ref[...]              # (K, N*Q)

    # --- NCHW-order flatten of .view(N, -1): out[n, k*Q + q] = pred[k, n*Q + q] ---
    for n in range(N):
        for k in range(K):
            o_ref[n:n + 1, k * Q:(k + 1) * Q] = pred[k:k + 1, n * Q:(n + 1) * Q]


def pretrained_forward(x_nchw, w1, b1, w2, b2):
    N, Cin, H, W = x_nchw.shape
    F = w1.shape[-1]
    K = w2.shape[-1]
    Hp, Wp = H // 2, W // 2
    Q = Hp * Wp
    C9 = 9 * Cin
    Mtot = 4 * N * Q          # == N * H * W

    # NCHW -> NHWC, pad H/W by 1 (conv padding=1), then im2col with rows
    # ordered (pool_tap=hb*2+wb, n, hp, wp) and columns ordered (kh, kw, cin).
    # This is cheap wrapper glue (~70 KB) that XLA fuses into one gather.
    x_nhwc = jnp.transpose(x_nchw, (0, 2, 3, 1)).astype(jnp.float32)
    x_pad = jnp.pad(x_nhwc, ((0, 0), (1, 1), (1, 1), (0, 0)))
    taps = jnp.concatenate(
        [x_pad[:, kh:kh + H, kw:kw + W, :] for kh in range(3) for kw in range(3)],
        axis=-1)                                               # (N, H, W, 9*Cin)
    t = taps.reshape(N, Hp, 2, Wp, 2, C9)                      # (n, hp, hb, wp, wb, c)
    t = jnp.transpose(t, (2, 4, 0, 1, 3, 5))                   # (hb, wb, n, hp, wp, c)
    patches = t.reshape(Mtot, C9)

    w1_2d = w1.reshape(C9, F).astype(jnp.float32)              # (9*Cin, F)
    b1_row = b1.reshape(1, F).astype(jnp.float32)
    w2_t = jnp.transpose(w2).astype(jnp.float32)               # (K, F)
    b2_col = b2.reshape(K, 1).astype(jnp.float32)

    kernel = functools.partial(pretrained_kernel, N=N, Q=Q, K=K)

    out = pl.pallas_call(
        kernel,
        out_shape=jax.ShapeDtypeStruct((N, K * Q), jnp.float32),
        grid_spec=pltpu.PrefetchScalarGridSpec(
            num_scalar_prefetch=0,
            grid=(1,),                                   # whole problem in one step
            in_specs=[
                pl.BlockSpec((Mtot, C9), lambda i: (0, 0)),
                pl.BlockSpec((C9, F), lambda i: (0, 0)),
                pl.BlockSpec((1, F), lambda i: (0, 0)),
                pl.BlockSpec((K, F), lambda i: (0, 0)),
                pl.BlockSpec((K, 1), lambda i: (0, 0)),
            ],
            out_specs=pl.BlockSpec((N, K * Q), lambda i: (0, 0)),
        ),
        compiler_params=pltpu.CompilerParams(
            dimension_semantics=("arbitrary",)),
    )(patches, w1_2d, b1_row, w2_t, b2_col)

    return out                                           # (N, K*Hp*Wp), NCHW-flatten order


def reference_forward(x_nchw, w1, b1, w2, b2):
    """Pure-JAX reference of the same forward (for verification)."""
    N, Cin, H, W = x_nchw.shape
    F = w1.shape[-1]
    K = w2.shape[-1]
    xp = jnp.pad(x_nchw, ((0, 0), (0, 0), (1, 1), (1, 1)))
    out = jnp.zeros((N, H, W, F), jnp.float32)
    for kh in range(3):
        for kw in range(3):
            patch = xp[:, :, kh:kh + H, kw:kw + W]            # (N,Cin,H,W)
            out = out + jnp.einsum('nchw,cf->nhwf', patch, w1[kh, kw],
                                   precision='highest')
    out = jnp.maximum(out + b1[0], 0.0)
    out = out.reshape(N, H // 2, 2, W // 2, 2, F).max(axis=(2, 4))
    pred = jnp.einsum('nhwf,fk->nkhw', out, w2, precision='highest') \
        + b2[0][None, :, None, None]
    return pred.reshape(N, -1)


if __name__ == "__main__":
    key = jax.random.PRNGKey(0)
    k1, k2, k3, k4, k5 = jax.random.split(key, 5)

    N, Cin, H, W = 2, 4, 16, 16   # small NCHW input
    F, K = 32, 2                  # feature channels / predicted classes

    x = jax.random.normal(k1, (N, Cin, H, W), dtype=jnp.float32)

    # features: Conv2d(Cin, F, 3, padding=1) — weights in (kh, kw, Cin, F) layout.
    w1 = jax.random.normal(k2, (3, 3, Cin, F), jnp.float32) * math.sqrt(2.0 / (3 * 3 * Cin))
    b1 = jax.random.normal(k3, (1, F), jnp.float32) * 0.01
    # predict: Conv2d(F, K, 1) — xavier_init2d: normal(0, sqrt(2/(1*1*F))).
    w2 = jax.random.normal(k4, (F, K), jnp.float32) * math.sqrt(2.0 / F)
    b2 = jax.random.normal(k5, (1, K), jnp.float32) * 0.01

    probs = pretrained_forward(x, w1, b1, w2, b2)
    probs = jax.block_until_ready(probs)

    ref = reference_forward(x, w1, b1, w2, b2)
    assert probs.shape == (N, K * (H // 2) * (W // 2)), probs.shape
    if not jnp.allclose(probs, ref, rtol=1e-3, atol=1e-3):
        raise AssertionError("Pallas kernel output does not match JAX reference")

    print("KERNEL_OK")
</pallas_src>

<mosaic_0001>
module attributes {stable_mosaic.version = 11 : i64} {
  func.func @pretrained_kernel(%arg0: i32, %arg1: memref<512x36xf32, #tpu.memory_space<vmem>>, %arg2: memref<36x32xf32, #tpu.memory_space<vmem>>, %arg3: memref<1x32xf32, #tpu.memory_space<vmem>>, %arg4: memref<2x32xf32, #tpu.memory_space<vmem>>, %arg5: memref<2x1xf32, #tpu.memory_space<vmem>>, %arg6: memref<2x128xf32, #tpu.memory_space<vmem>>) attributes {dimension_semantics = [#tpu.dimension_semantics<arbitrary>], iteration_bounds = array<i64: 1>, scalar_prefetch = 0 : i64, scratch_operands = 0 : i64, tpu.core_type = #tpu.core_type<tc>, window_params = [{pipeline_mode = #tpu.pipeline_mode<synchronous>, transform_indices = @transform_0, window_bounds = array<i64: 512, 36>}, {pipeline_mode = #tpu.pipeline_mode<synchronous>, transform_indices = @transform_1, window_bounds = array<i64: 36, 32>}, {pipeline_mode = #tpu.pipeline_mode<synchronous>, transform_indices = @transform_2, window_bounds = array<i64: 1, 32>}, {pipeline_mode = #tpu.pipeline_mode<synchronous>, transform_indices = @transform_3, window_bounds = array<i64: 2, 32>}, {pipeline_mode = #tpu.pipeline_mode<synchronous>, transform_indices = @transform_4, window_bounds = array<i64: 2, 1>}, {pipeline_mode = #tpu.pipeline_mode<synchronous>, transform_indices = @transform_5, window_bounds = array<i64: 2, 128>}]} {
    %c0 = arith.constant 0 : index
    %c0_0 = arith.constant 0 : index
    %0 = vector.load %arg1[%c0, %c0_0] : memref<512x36xf32, #tpu.memory_space<vmem>>, vector<512x36xf32>
    %c0_1 = arith.constant 0 : index
    %c0_2 = arith.constant 0 : index
    %1 = vector.load %arg2[%c0_1, %c0_2] : memref<36x32xf32, #tpu.memory_space<vmem>>, vector<36x32xf32>
    %cst = arith.constant dense<0.000000e+00> : vector<512x32xf32>
    %2 = tpu.matmul %0, %1, %cst {dimension_numbers = #tpu.dot_dimension_numbers<[1], [0], [0], [1], [0, 0, 1, 1], [], []>} : vector<512x36xf32>, vector<36x32xf32>, vector<512x32xf32> -> vector<512x32xf32>
    %c0_3 = arith.constant 0 : index
    %c0_4 = arith.constant 0 : index
    %3 = vector.load %arg3[%c0_3, %c0_4] : memref<1x32xf32, #tpu.memory_space<vmem>>, vector<1x32xf32>
    %4 = vector.broadcast %3 : vector<1x32xf32> to vector<512x32xf32>
    %5 = arith.addf %2, %4 : vector<512x32xf32>
    %cst_5 = arith.constant 0.000000e+00 : f32
    %6 = vector.broadcast %cst_5 : f32 to vector<512x32xf32>
    %7 = arith.maximumf %5, %6 : vector<512x32xf32>
    %8 = vector.extract_strided_slice %7 {offsets = [0, 0], sizes = [128, 32], strides = [1, 1]} : vector<512x32xf32> to vector<128x32xf32>
    %9 = vector.extract_strided_slice %7 {offsets = [128, 0], sizes = [128, 32], strides = [1, 1]} : vector<512x32xf32> to vector<128x32xf32>
    %10 = arith.maximumf %8, %9 : vector<128x32xf32>
    %11 = vector.extract_strided_slice %7 {offsets = [256, 0], sizes = [128, 32], strides = [1, 1]} : vector<512x32xf32> to vector<128x32xf32>
    %12 = vector.extract_strided_slice %7 {offsets = [384, 0], sizes = [128, 32], strides = [1, 1]} : vector<512x32xf32> to vector<128x32xf32>
    %13 = arith.maximumf %11, %12 : vector<128x32xf32>
    %14 = arith.maximumf %10, %13 : vector<128x32xf32>
    %c0_6 = arith.constant 0 : index
    %c0_7 = arith.constant 0 : index
    %15 = vector.load %arg4[%c0_6, %c0_7] : memref<2x32xf32, #tpu.memory_space<vmem>>, vector<2x32xf32>
    %cst_8 = arith.constant dense<0.000000e+00> : vector<2x128xf32>
    %16 = tpu.matmul %15, %14, %cst_8 {dimension_numbers = #tpu.dot_dimension_numbers<[1], [1], [0], [0], [0, 0, 1, 0], [], []>} : vector<2x32xf32>, vector<128x32xf32>, vector<2x128xf32> -> vector<2x128xf32>
    %c0_9 = arith.constant 0 : index
    %c0_10 = arith.constant 0 : index
    %17 = vector.load %arg5[%c0_9, %c0_10] : memref<2x1xf32, #tpu.memory_space<vmem>>, vector<2x1xf32>
    %18 = vector.broadcast %17 : vector<2x1xf32> to vector<2x128xf32>
    %19 = arith.addf %16, %18 : vector<2x128xf32>
    %20 = vector.extract_strided_slice %19 {offsets = [0, 0], sizes = [1, 64], strides = [1, 1]} : vector<2x128xf32> to vector<1x64xf32>
    %c0_11 = arith.constant 0 : index
    %c0_12 = arith.constant 0 : index
    %21 = vector.load %arg6[%c0_11, %c0_12] : memref<2x128xf32, #tpu.memory_space<vmem>>, vector<1x64xf32>
    tpu.vector_store %arg6[%c0_11, %c0_12], %20 {strides = array<i32>} : memref<2x128xf32, #tpu.memory_space<vmem>>, vector<1x64xf32>,
    %22 = vector.extract_strided_slice %19 {offsets = [1, 0], sizes = [1, 64], strides = [1, 1]} : vector<2x128xf32> to vector<1x64xf32>
    %c0_13 = arith.constant 0 : index
    %c64 = arith.constant 64 : index
    %23 = vector.load %arg6[%c0_13, %c64] : memref<2x128xf32, #tpu.memory_space<vmem>>, vector<1x64xf32>
    tpu.vector_store %arg6[%c0_13, %c64], %22 {strides = array<i32>} : memref<2x128xf32, #tpu.memory_space<vmem>>, vector<1x64xf32>,
    %24 = vector.extract_strided_slice %19 {offsets = [0, 64], sizes = [1, 64], strides = [1, 1]} : vector<2x128xf32> to vector<1x64xf32>
    %c1 = arith.constant 1 : index
    %c0_14 = arith.constant 0 : index
    %25 = vector.load %arg6[%c1, %c0_14] : memref<2x128xf32, #tpu.memory_space<vmem>>, vector<1x64xf32>
    tpu.vector_store %arg6[%c1, %c0_14], %24 {strides = array<i32>} : memref<2x128xf32, #tpu.memory_space<vmem>>, vector<1x64xf32>,
    %26 = vector.extract_strided_slice %19 {offsets = [1, 64], sizes = [1, 64], strides = [1, 1]} : vector<2x128xf32> to vector<1x64xf32>
    %c1_15 = arith.constant 1 : index
    %c64_16 = arith.constant 64 : index
    %27 = vector.load %arg6[%c1_15, %c64_16] : memref<2x128xf32, #tpu.memory_space<vmem>>, vector<1x64xf32>
    tpu.vector_store %arg6[%c1_15, %c64_16], %26 {strides = array<i32>} : memref<2x128xf32, #tpu.memory_space<vmem>>, vector<1x64xf32>,
    return
  }
  func.func @transform_0(%arg0: i32) -> (i32, i32) {
    %c0_i32 = arith.constant 0 : i32
    %c0_i32_0 = arith.constant 0 : i32
    %c0_i32_1 = arith.constant 0 : i32
    return %c0_i32, %c0_i32_0 : i32, i32
  }
  func.func @transform_1(%arg0: i32) -> (i32, i32) {
    %c0_i32 = arith.constant 0 : i32
    %c0_i32_0 = arith.constant 0 : i32
    %c0_i32_1 = arith.constant 0 : i32
    return %c0_i32, %c0_i32_0 : i32, i32
  }
  func.func @transform_2(%arg0: i32) -> (i32, i32) {
    %c0_i32 = arith.constant 0 : i32
    %c0_i32_0 = arith.constant 0 : i32
    %c0_i32_1 = arith.constant 0 : i32
    return %c0_i32, %c0_i32_0 : i32, i32
  }
  func.func @transform_3(%arg0: i32) -> (i32, i32) {
    %c0_i32 = arith.constant 0 : i32
    %c0_i32_0 = arith.constant 0 : i32
    %c0_i32_1 = arith.constant 0 : i32
    return %c0_i32, %c0_i32_0 : i32, i32
  }
  func.func @transform_4(%arg0: i32) -> (i32, i32) {
    %c0_i32 = arith.constant 0 : i32
    %c0_i32_0 = arith.constant 0 : i32
    %c0_i32_1 = arith.constant 0 : i32
    return %c0_i32, %c0_i32_0 : i32, i32
  }
  func.func @transform_5(%arg0: i32) -> (i32, i32) {
    %c0_i32 = arith.constant 0 : i32
    %c0_i32_0 = arith.constant 0 : i32
    %c0_i32_1 = arith.constant 0 : i32
    return %c0_i32, %c0_i32_0 : i32, i32
  }
}

</mosaic_0001>

<bundles_post_ra>
// kernel: tpu_custom_call.1
= control target key start
LH: loop header
LB: loop body
LE: loop exit
PB: predicated region body
PF: predicated region fallthrough
CT: control target
= control target key end

     0   :  { %vm97_vm0 = vcmask 293888   ;;  %vm290_vm1 = vcmask 1043456   ;;  %s1837_s0 = inlined_call_operand.vmem [shape: f32[512,36], index: 0, kind: input, shape index: {}]   ;;  %s1838_s1 = inlined_call_operand.vmem [shape: f32[36,32], index: 1, kind: input, shape index: {}]   ;;  %s1839_s2 = inlined_call_operand.vmem [shape: f32[1,32], index: 2, kind: input, shape index: {}]   ;;  %s1840_s3 = inlined_call_operand.vmem [shape: f32[2,32], index: 3, kind: input, shape index: {}]   ;;  %s1841_s4 = inlined_call_operand.vmem [shape: f32[2,1], index: 4, kind: input, shape index: {}]   ;;  %s1842_s5 = inlined_call_operand.hbm [shape: f32[2,128], index: 5, kind: output, shape index: {}]  }
   0x1   :  { %v85_v0 = vld [vmem:[%s1838_s1] sm:$0xff]  ;;  %v86_v1 = vld [vmem:[%s1838_s1 + $0x8] sm:$0xff]  ;;  %v87_v2 = vld [vmem:[%s1838_s1 + $0x10] sm:$0xff] }
   0x2   :  { %v1254_v3 = vpack.c.bf16 %v86_v1, %v85_v0  ;;  %v88_v4 = vld [vmem:[%s1838_s1 + $0x18] sm:$0xff]  ;;  %v21_v5 = vld [vmem:[%s1837_s0] sm:$0xff]  ;;  %v22_v8 = vld [vmem:[%s1837_s0 + $0x8] sm:$0xff] }
   0x3   :  { %v1258_v6 = vpack.c.bf16 %v88_v4, %v87_v2  ;;  %1123 = vmatprep.mubr.msk.f32.mxu0 %vm97_vm0, %v21_v5  ;;  %v89_v7 = vld [vmem:[%s1838_s1 + $0x20] sm:$0xf]  ;;  %v23_v9 = vld [vmem:[%s1837_s0 + $0x10] sm:$0xff]  ;;  %v24_v10 = vld [vmem:[%s1837_s0 + $0x18] sm:$0xff] }
   0x4   :  { %1255 = vmatprep.subr.bf16.mxu0 %v1254_v3  ;;  %v25_v11 = vld [vmem:[%s1837_s0 + $0x20] sm:$0xff]  ;;  %v26_v12 = vld [vmem:[%s1837_s0 + $0x28] sm:$0xff]  ;;  %v27_v13 = vld [vmem:[%s1837_s0 + $0x30] sm:$0xff] }
   0x5   :  { %1257 = vmatpush3.bf16.msra.mxu0 %v1254_v3  ;;  %v28_v14 = vld [vmem:[%s1837_s0 + $0x38] sm:$0xff]  ;;  %v29_v15 = vld [vmem:[%s1837_s0 + $0x40] sm:$0xff] }
   0x6   :  { %1259 = vmatprep.subr.bf16.mxu0 %v1258_v6 }
   0x9   :  { %1261 = vmatpush3.bf16.msra.mxu0 %v1258_v6 }
   0xa   :  { %1121 = vmatprep.subr.msk.mxu0 %vm290_vm1, %v89_v7 }
   0xd   :  { %1122 = vmatpush3.msk.msra.mxu0 %vm290_vm1, %v89_v7 }
   0xe   :  { %1124 = vmatmul.mubr.msk.f32.vlgmr.msra.gmra.mrb[0].mxu0 %vm97_vm0, %v22_v8 }
   0xf   :  { %1126 = vmatprep.mubr.msk.f32.mxu0 %vm97_vm0, %v23_v9 }
  0x12   :  { %1127 = vmatmul.mubr.msk.f32.gmra.mrb[2].mxu0 %vm97_vm0, %v24_v10 }
  0x13   :  { %1129 = vmatprep.mubr.msk.f32.mxu0 %vm97_vm0, %v25_v11 }
  0x16   :  { %1130 = vmatmul.mubr.msk.f32.gmra.mrb[4].mxu0 %vm97_vm0, %v26_v12 }
  0x17   :  { %1132 = vmatprep.mubr.msk.f32.mxu0 %vm97_vm0, %v27_v13 }
  0x18   :  { %10 = vsyncpa [#allocation3], 0  ;;  %v30_v16 = vld [vmem:[%s1837_s0 + $0x48] sm:$0xff]  ;;  %v31_v17 = vld [vmem:[%s1837_s0 + $0x50] sm:$0xff]  ;;  %v1325_v7 = vmov 0.0|0.0   ;;  %vm1326_vm2 = vmmov 0  }
  0x19   :  { %v32_v18 = vld [vmem:[%s1837_s0 + $0x58] sm:$0xff]  ;;  %v33_v19 = vld [vmem:[%s1837_s0 + $0x60] sm:$0xff]  ;;  %v34_v20 = vld [vmem:[%s1837_s0 + $0x68] sm:$0xff]  ;;  %1262 = vmatprep.subr.bf16.mxu1 %v1325_v7  ;;  %vm798_vm3 = vcmask 261120   ;;  %vm920_vm5 = vcmask 516096   ;;  %s1329_s29 = smov 64  }
  0x1a   :  { %1133 = vmatmul.mubr.msk.f32.gmra.mrb[6].mxu0 %vm97_vm0, %v28_v14  ;;  %v35_v21 = vld [vmem:[%s1837_s0 + $0x70] sm:$0xff]  ;;  %v36_v22 = vld [vmem:[%s1837_s0 + $0x78] sm:$0xff]  ;;  %v37_v23 = vld [vmem:[%s1837_s0 + $0x80] sm:$0xff]  ;;  %s1330_s30 = smov [#allocation2]   ;;  %vm926_vm6 = vcmask 1041921  }
  0x1b   :  { %1135 = vmatprep.mubr.msk.f32.mxu0 %vm97_vm0, %v29_v15  ;;  %v38_v24 = vld [vmem:[%s1837_s0 + $0x88] sm:$0xff]  ;;  %v39_v25 = vld [vmem:[%s1837_s0 + $0x90] sm:$0xff]  ;;  %v40_v26 = vld [vmem:[%s1837_s0 + $0x98] sm:$0xff]  ;;  %s936_s6 = sshll.u32 %s1330_s30, 4  ;;  %s937_s6 = int_to_ptr.vmem [resolvable:$true] %s936_s6 }
  0x1c   :  { %v41_v27 = vld [vmem:[%s1837_s0 + $0xa0] sm:$0xff]  ;;  %v42_v28 = vld [vmem:[%s1837_s0 + $0xa8] sm:$0xff]  ;;  %v43_v29 = vld [vmem:[%s1837_s0 + $0xb0] sm:$0xff]  ;;  %s1301_s7 = scalar_lea.vmem %s937_s6, 32  ;;  %p1306_p1 = scmp.lt.s32.totalorder %s937_s6, %s937_s6 }
  0x1d   :  { %v44_v30 = vld [vmem:[%s1837_s0 + $0xb8] sm:$0xff]  ;;  %v45_v31 = vld [vmem:[%s1837_s0 + $0xc0] sm:$0xff]  ;;  %v46_v32 = vld [vmem:[%s1837_s0 + $0xc8] sm:$0xff]  ;;  %p1302_p0 = scmp.ne.s32.totalorder %s937_s6, %s1301_s7  ;;  %p1307_p2 = scmp.lt.s32.totalorder %s1301_s7, %s1301_s7 }
  0x1e   :  { %1136 = vmatmul.mubr.msk.f32.gmra.mrb[8].mxu0 %vm97_vm0, %v30_v16  ;;  %v47_v33 = vld [vmem:[%s1837_s0 + $0xd0] sm:$0xff]  ;;  %v48_v34 = vld [vmem:[%s1837_s0 + $0xd8] sm:$0xff]  ;;  %v49_v35 = vld [vmem:[%s1837_s0 + $0xe0] sm:$0xff] }
  0x1f   :  { %1138 = vmatprep.mubr.msk.f32.mxu0 %vm97_vm0, %v31_v17  ;;  %v50_v36 = vld [vmem:[%s1837_s0 + $0xe8] sm:$0xff]  ;;  %v51_v37 = vld [vmem:[%s1837_s0 + $0xf0] sm:$0xff]  ;;  %v52_v38 = vld [vmem:[%s1837_s0 + $0xf8] sm:$0xff]  ;;  %p1308_p3 = por %p1307_p2, %p1306_p1 }
  0x20   :  { %v53_v39 = vld [vmem:[%s1837_s0 + $0x100] sm:$0xff]  ;;  %v54_v40 = vld [vmem:[%s1837_s0 + $0x108] sm:$0xff]  ;;  %v55_v41 = vld [vmem:[%s1837_s0 + $0x110] sm:$0xff] }
  0x21   :  { %v56_v42 = vld [vmem:[%s1837_s0 + $0x118] sm:$0xff]  ;;  %v57_v43 = vld [vmem:[%s1837_s0 + $0x120] sm:$0xff]  ;;  %v58_v44 = vld [vmem:[%s1837_s0 + $0x128] sm:$0xff]  ;;  %p1309_p4 = pnand %p1308_p3, %p1302_p0 }
  0x22   :  { %1139 = vmatmul.mubr.msk.f32.gmra.mrb[10].mxu0 %vm97_vm0, %v32_v18  ;;  %v59_v45 = vld [vmem:[%s1837_s0 + $0x130] sm:$0xff]  ;;  %v60_v46 = vld [vmem:[%s1837_s0 + $0x138] sm:$0xff]  ;;  %v61_v47 = vld [vmem:[%s1837_s0 + $0x140] sm:$0xff] }
  0x23   :  { %1141 = vmatprep.mubr.msk.f32.mxu0 %vm97_vm0, %v33_v19  ;;  %v62_v48 = vld [vmem:[%s1837_s0 + $0x148] sm:$0xff]  ;;  %v63_v49 = vld [vmem:[%s1837_s0 + $0x150] sm:$0xff]  ;;  %v64_v50 = vld [vmem:[%s1837_s0 + $0x158] sm:$0xff] }
  0x24   :  { %v65_v51 = vld [vmem:[%s1837_s0 + $0x160] sm:$0xff]  ;;  %v66_v52 = vld [vmem:[%s1837_s0 + $0x168] sm:$0xff]  ;;  %v67_v53 = vld [vmem:[%s1837_s0 + $0x170] sm:$0xff] }
  0x25   :  { %v68_v54 = vld [vmem:[%s1837_s0 + $0x178] sm:$0xff]  ;;  %v69_v55 = vld [vmem:[%s1837_s0 + $0x180] sm:$0xff]  ;;  %v70_v56 = vld [vmem:[%s1837_s0 + $0x188] sm:$0xff] }
  0x26   :  { %1142 = vmatmul.mubr.msk.f32.gmra.mrb[12].mxu0 %vm97_vm0, %v34_v20  ;;  %v71_v57 = vld [vmem:[%s1837_s0 + $0x190] sm:$0xff]  ;;  %v72_v58 = vld [vmem:[%s1837_s0 + $0x198] sm:$0xff]  ;;  %v73_v59 = vld [vmem:[%s1837_s0 + $0x1a0] sm:$0xff] }
  0x27   :  { %1144 = vmatprep.mubr.msk.f32.mxu0 %vm97_vm0, %v35_v21  ;;  %v74_v60 = vld [vmem:[%s1837_s0 + $0x1a8] sm:$0xff]  ;;  %v75_v61 = vld [vmem:[%s1837_s0 + $0x1b0] sm:$0xff]  ;;  %v76_v62 = vld [vmem:[%s1837_s0 + $0x1b8] sm:$0xff] }
  0x28   :  { %v77_v63 = vld [vmem:[%s1837_s0 + $0x1c0] sm:$0xff]  ;;  %v78_v0 = vld [vmem:[%s1837_s0 + $0x1c8] sm:$0xff]  ;;  %v79_v1 = vld [vmem:[%s1837_s0 + $0x1d0] sm:$0xff] }
  0x29   :  { %v80_v2 = vld [vmem:[%s1837_s0 + $0x1d8] sm:$0xff]  ;;  %v81_v3 = vld [vmem:[%s1837_s0 + $0x1e0] sm:$0xff]  ;;  %v82_v4 = vld [vmem:[%s1837_s0 + $0x1e8] sm:$0xff] }
  0x2a   :  { %1145 = vmatmul.mubr.msk.f32.gmra.mrb[14].mxu0 %vm97_vm0, %v36_v22  ;;  %v83_v5 = vld [vmem:[%s1837_s0 + $0x1f0] sm:$0xff]  ;;  %v84_v6 = vld [vmem:[%s1837_s0 + $0x1f8] sm:$0xff]  ;;  %v1644_v22 = vld [vmem:[%s1839_s2] ss:$0 sm:$0xff] }
  0x2b   :  { %1147 = vmatprep.mubr.msk.f32.mxu0 %vm97_vm0, %v37_v23  ;;  %vm1752_vm4 = vmpackc.low %vm798_vm3, %vm798_vm3 }
  0x2e   :  { %1148 = vmatmul.mubr.msk.f32.gmra.mrb[16].mxu0 %vm97_vm0, %v38_v24 }
  0x2f   :  { %1150 = vmatprep.mubr.msk.f32.mxu0 %vm97_vm0, %v39_v25 }
  0x32   :  { %1151 = vmatmul.mubr.msk.f32.gmra.mrb[18].mxu0 %vm97_vm0, %v40_v26 }
  0x33   :  { %1153 = vmatprep.mubr.msk.f32.mxu0 %vm97_vm0, %v41_v27 }
  0x36   :  { %1154 = vmatmul.mubr.msk.f32.gmra.mrb[20].mxu0 %vm97_vm0, %v42_v28 }
  0x37   :  { %1156 = vmatprep.mubr.msk.f32.mxu0 %vm97_vm0, %v43_v29 }
  0x3a   :  { %1157 = vmatmul.mubr.msk.f32.gmra.mrb[22].mxu0 %vm97_vm0, %v44_v30 }
  0x3b   :  { %1159 = vmatprep.mubr.msk.f32.mxu0 %vm97_vm0, %v45_v31 }
  0x3e   :  { %1160 = vmatmul.mubr.msk.f32.gmra.mrb[24].mxu0 %vm97_vm0, %v46_v32 }
  0x3f   :  { %1162 = vmatprep.mubr.msk.f32.mxu0 %vm97_vm0, %v47_v33 }
  0x42   :  { %1163 = vmatmul.mubr.msk.f32.gmra.mrb[26].mxu0 %vm97_vm0, %v48_v34 }
  0x43   :  { %1165 = vmatprep.mubr.msk.f32.mxu0 %vm97_vm0, %v49_v35 }
  0x46   :  { %1166 = vmatmul.mubr.msk.f32.gmra.mrb[28].mxu0 %vm97_vm0, %v50_v36 }
  0x47   :  { %1168 = vmatprep.mubr.msk.f32.mxu0 %vm97_vm0, %v51_v37 }
  0x4a   :  { %1169 = vmatmul.mubr.msk.f32.gmra.mrb[30].mxu0 %vm97_vm0, %v52_v38 }
  0x4b   :  { %1171 = vmatprep.mubr.msk.f32.mxu0 %vm97_vm0, %v53_v39 }
  0x4e   :  { %1172 = vmatmul.mubr.msk.f32.gmra.mrb[32].mxu0 %vm97_vm0, %v54_v40 }
  0x4f   :  { %1174 = vmatprep.mubr.msk.f32.mxu0 %vm97_vm0, %v55_v41  ;;  %v1327_v41 = vmov 0.0  }
  0x50   :  { %1251 = vmatprep.mubr.msk.f32.mxu1 %vm1326_vm2, %v1327_v41 }
  0x52   :  { %1175 = vmatmul.mubr.msk.f32.gmra.mrb[34].mxu0 %vm97_vm0, %v56_v42 }
  0x53   :  { %1177 = vmatprep.mubr.msk.f32.mxu0 %vm97_vm0, %v57_v43 }
  0x56   :  { %1178 = vmatmul.mubr.msk.f32.gmra.mrb[36].mxu0 %vm97_vm0, %v58_v44 }
  0x57   :  { %1180 = vmatprep.mubr.msk.f32.mxu0 %vm97_vm0, %v59_v45 }
  0x5a   :  { %1181 = vmatmul.mubr.msk.f32.gmra.mrb[38].mxu0 %vm97_vm0, %v60_v46 }
  0x5b   :  { %1183 = vmatprep.mubr.msk.f32.mxu0 %vm97_vm0, %v61_v47 }
  0x5e   :  { %1184 = vmatmul.mubr.msk.f32.gmra.mrb[40].mxu0 %vm97_vm0, %v62_v48 }
  0x5f   :  { %1186 = vmatprep.mubr.msk.f32.mxu0 %vm97_vm0, %v63_v49 }
  0x62   :  { %1187 = vmatmul.mubr.msk.f32.gmra.mrb[42].mxu0 %vm97_vm0, %v64_v50 }
  0x63   :  { %1189 = vmatprep.mubr.msk.f32.mxu0 %vm97_vm0, %v65_v51 }
  0x66   :  { %1190 = vmatmul.mubr.msk.f32.gmra.mrb[44].mxu0 %vm97_vm0, %v66_v52 }
  0x67   :  { %1192 = vmatprep.mubr.msk.f32.mxu0 %vm97_vm0, %v67_v53 }
  0x6a   :  { %1193 = vmatmul.mubr.msk.f32.gmra.mrb[46].mxu0 %vm97_vm0, %v68_v54 }
  0x6b   :  { %1195 = vmatprep.mubr.msk.f32.mxu0 %vm97_vm0, %v69_v55 }
  0x6e   :  { %1196 = vmatmul.mubr.msk.f32.gmra.mrb[48].mxu0 %vm97_vm0, %v70_v56 }
  0x6f   :  { %1198 = vmatprep.mubr.msk.f32.mxu0 %vm97_vm0, %v71_v57 }
  0x72   :  { %1199 = vmatmul.mubr.msk.f32.gmra.mrb[50].mxu0 %vm97_vm0, %v72_v58 }
  0x73   :  { %1201 = vmatprep.mubr.msk.f32.mxu0 %vm97_vm0, %v73_v59  ;;  %v792_v59 = vld [vmem:[%s1841_s4] sm:$0x3] }
  0x76   :  { %1202 = vmatmul.mubr.msk.f32.gmra.mrb[52].mxu0 %vm97_vm0, %v74_v60 }
  0x77   :  { %1204 = vmatprep.mubr.msk.f32.mxu0 %vm97_vm0, %v75_v61 }
  0x7a   :  { %1205 = vmatmul.mubr.msk.f32.gmra.mrb[54].mxu0 %vm97_vm0, %v76_v62 }
  0x7b   :  { %1207 = vmatprep.mubr.msk.f32.mxu0 %vm97_vm0, %v77_v63 }
  0x7e   :  { %1208 = vmatmul.mubr.msk.f32.gmra.mrb[56].mxu0 %vm97_vm0, %v78_v0  ;;  %v1328_v0 = vmov 0  }
  0x7f   :  { %1210 = vmatprep.mubr.msk.f32.mxu0 %vm97_vm0, %v79_v1  ;;  %1300 = vset.pattern.permute.xlu0 %v1328_v0 }
  0x80   :  { %795 = vperm.xlu0 %1300, %v792_v59  }
  0x82   :  { %1211 = vmatmul.mubr.msk.f32.gmra.mrb[58].mxu0 %vm97_vm0, %v80_v2 }
  0x83   :  { %1213 = vmatprep.mubr.msk.f32.mxu0 %vm97_vm0, %v81_v3 }
  0x86   :  { %1214 = vmatmul.mubr.msk.f32.gmra.mrb[60].mxu0 %vm97_vm0, %v82_v4 }
  0x87   :  { %1216 = vmatprep.mubr.msk.f32.mxu0 %vm97_vm0, %v83_v5 }
  0x8a   :  { %1217 = vmatmul.mubr.msk.f32.gmra.mrb[62].mxu0 %vm97_vm0, %v84_v6 }
  0xe1   :  { %v1125_v8 = vpop.f32.mrb[0].mxu0 }
  0xe2   :  { %v360_v9 = vpop.f32.mrb[1].mxu0  ;;  %v366_v25 = vadd.f32 %v1125_v8, %v1644_v22 }
  0xe3   :  { %v361_v26 = vadd.f32 %v1644_v22, %v360_v9 }
  0xe4   :  { %v680_v31 = vmax.f32 %v366_v25, 0.0 }
  0xe5   :  { %v1128_v10 = vpop.f32.mrb[2].mxu0  ;;  %v679_v32 = vmax.f32 %v361_v26, 0.0 }
  0xe6   :  { %v370_v11 = vpop.f32.mrb[3].mxu0  ;;  %v376_v33 = vadd.f32 %v1128_v10, %v1644_v22 }
  0xe7   :  { %v371_v35 = vadd.f32 %v1644_v22, %v370_v11 }
  0xe8   :  { %v682_v44 = vmax.f32 %v376_v33, 0.0 }
  0xe9   :  { %v1131_v12 = vpop.f32.mrb[4].mxu0  ;;  %v681_v47 = vmax.f32 %v371_v35, 0.0 }
  0xea   :  { %v380_v13 = vpop.f32.mrb[5].mxu0  ;;  %v386_v45 = vadd.f32 %v1131_v12, %v1644_v22 }
  0xeb   :  { %v381_v48 = vadd.f32 %v1644_v22, %v380_v13 }
  0xec   :  { %v684_v56 = vmax.f32 %v386_v45, 0.0 }
  0xed   :  { %v1134_v14 = vpop.f32.mrb[6].mxu0  ;;  %v683_v60 = vmax.f32 %v381_v48, 0.0 }
  0xee   :  { %v390_v15 = vpop.f32.mrb[7].mxu0  ;;  %v396_v57 = vadd.f32 %v1134_v14, %v1644_v22 }
  0xef   :  { %v391_v61 = vadd.f32 %v1644_v22, %v390_v15 }
  0xf0   :  { %v686_v6 = vmax.f32 %v396_v57, 0.0 }
  0xf1   :  { %v1137_v16 = vpop.f32.mrb[8].mxu0  ;;  %v685_v10 = vmax.f32 %v391_v61, 0.0 }
  0xf2   :  { %v400_v17 = vpop.f32.mrb[9].mxu0  ;;  %v406_v8 = vadd.f32 %v1137_v16, %v1644_v22 }
  0xf3   :  { %v401_v11 = vadd.f32 %v1644_v22, %v400_v17 }
  0xf5   :  { %v1633_v18 = vpop.f32.mrb[10].mxu0 }
  0xf6   :  { %v1635_v19 = vpop.f32.mrb[11].mxu0 }
  0xf7   :  { %v411_v17 = vadd.f32 %v1644_v22, %v1635_v19 }
  0xf9   :  { %v1637_v20 = vpop.f32.mrb[12].mxu0  ;;  %v689_v41 = vmax.f32 %v411_v17, 0.0 }
  0xfa   :  { %v1639_v21 = vpop.f32.mrb[13].mxu0 }
  0xfb   :  { %v421_v19 = vadd.f32 %v1644_v22, %v1639_v21 }
  0xfd   :  { %v1646_v23 = vpop.f32.mrb[14].mxu0 }
  0xfe   :  { %v1648_v24 = vpop.f32.mrb[15].mxu0 }
  0xff   :  { %v431_v21 = vadd.f32 %v1644_v22, %v1648_v24 }
 0x101   :  { %v1149_v27 = vpop.f32.mrb[16].mxu0  ;;  %v693_v0 = vmax.f32 %v431_v21, 0.0 }
 0x102   :  { %v446_v28 = vadd.f32 %v1149_v27, %v1644_v22  ;;  %v440_v29 = vpop.f32.mrb[17].mxu0 }
 0x103   :  { %v441_v30 = vadd.f32 %v1644_v22, %v440_v29  ;;  %v416_v29 = vadd.f32 %v1633_v18, %v1644_v22  ;;  %v426_v18 = vadd.f32 %v1637_v20, %v1644_v22  ;;  %v436_v20 = vadd.f32 %v1646_v23, %v1644_v22 }
 0x104   :  { %v696_v34 = vmax.f32 %v446_v28, 0.0  ;;  %v688_v28 = vmax.f32 %v406_v8, 0.0 }
 0x105   :  { %v695_v36 = vmax.f32 %v441_v30, 0.0  ;;  %v1152_v37 = vpop.f32.mrb[18].mxu0  ;;  %v687_v30 = vmax.f32 %v401_v11, 0.0 }
 0x106   :  { %v1656_v38 = vmax.f32 %v680_v31, %v696_v34  ;;  %v456_v39 = vadd.f32 %v1152_v37, %v1644_v22  ;;  %v450_v40 = vpop.f32.mrb[19].mxu0 }
 0x107   :  { %v1659_v42 = vmax.f32 %v679_v32, %v695_v36  ;;  %v451_v43 = vadd.f32 %v1644_v22, %v450_v40 }
 0x108   :  { %v698_v46 = vmax.f32 %v456_v39, 0.0  ;;  %v690_v39 = vmax.f32 %v416_v29, 0.0 }
 0x109   :  { %v697_v49 = vmax.f32 %v451_v43, 0.0  ;;  %v1155_v50 = vpop.f32.mrb[20].mxu0 }
 0x10a   :  { %v1664_v51 = vmax.f32 %v682_v44, %v698_v46  ;;  %v466_v52 = vadd.f32 %v1155_v50, %v1644_v22  ;;  %v460_v53 = vpop.f32.mrb[21].mxu0  ;;  %v692_v50 = vmax.f32 %v426_v18, 0.0 }
 0x10b   :  { %v1667_v54 = vmax.f32 %v681_v47, %v697_v49  ;;  %v461_v55 = vadd.f32 %v1644_v22, %v460_v53  ;;  %v691_v53 = vmax.f32 %v421_v19, 0.0 }
 0x10c   :  { %v700_v58 = vmax.f32 %v466_v52, 0.0 }
 0x10d   :  { %v699_v62 = vmax.f32 %v461_v55, 0.0  ;;  %v1158_v63 = vpop.f32.mrb[22].mxu0 }
 0x10e   :  { %v1675_v1 = vmax.f32 %v684_v56, %v700_v58  ;;  %v476_v2 = vadd.f32 %v1158_v63, %v1644_v22  ;;  %v470_v3 = vpop.f32.mrb[23].mxu0 }
 0x10f   :  { %v1678_v4 = vmax.f32 %v683_v60, %v699_v62  ;;  %v471_v5 = vadd.f32 %v1644_v22, %v470_v3  ;;  %v694_v62 = vmax.f32 %v436_v20, 0.0 }
 0x110   :  { %v702_v9 = vmax.f32 %v476_v2, 0.0 }
 0x111   :  { %v701_v12 = vmax.f32 %v471_v5, 0.0  ;;  %v1161_v13 = vpop.f32.mrb[24].mxu0 }
 0x112   :  { %v1683_v14 = vmax.f32 %v686_v6, %v702_v9  ;;  %v486_v15 = vadd.f32 %v1161_v13, %v1644_v22  ;;  %v480_v25 = vpop.f32.mrb[25].mxu0 }
 0x113   :  { %v1686_v26 = vmax.f32 %v685_v10, %v701_v12  ;;  %v481_v27 = vadd.f32 %v1644_v22, %v480_v25 }
 0x114   :  { %v704_v16 = vmax.f32 %v486_v15, 0.0 }
 0x115   :  { %v703_v31 = vmax.f32 %v481_v27, 0.0  ;;  %v1164_v32 = vpop.f32.mrb[26].mxu0 }
 0x116   :  { %v1693_v33 = vmax.f32 %v688_v28, %v704_v16  ;;  %v496_v34 = vadd.f32 %v1164_v32, %v1644_v22  ;;  %v490_v35 = vpop.f32.mrb[27].mxu0 }
 0x117   :  { %v1696_v36 = vmax.f32 %v687_v30, %v703_v31  ;;  %v491_v37 = vadd.f32 %v1644_v22, %v490_v35 }
 0x118   :  { %v706_v40 = vmax.f32 %v496_v34, 0.0 }
 0x119   :  { %v705_v43 = vmax.f32 %v491_v37, 0.0  ;;  %v1167_v44 = vpop.f32.mrb[28].mxu0 }
 0x11a   :  { %v1703_v45 = vmax.f32 %v690_v39, %v706_v40  ;;  %v506_v46 = vadd.f32 %v1167_v44, %v1644_v22  ;;  %v500_v47 = vpop.f32.mrb[29].mxu0 }
 0x11b   :  { %v1706_v48 = vmax.f32 %v689_v41, %v705_v43  ;;  %v501_v49 = vadd.f32 %v1644_v22, %v500_v47 }
 0x11c   :  { %v708_v52 = vmax.f32 %v506_v46, 0.0 }
 0x11d   :  { %v707_v55 = vmax.f32 %v501_v49, 0.0  ;;  %v1170_v56 = vpop.f32.mrb[30].mxu0 }
 0x11e   :  { %v1713_v57 = vmax.f32 %v692_v50, %v708_v52  ;;  %v516_v58 = vadd.f32 %v1170_v56, %v1644_v22  ;;  %v510_v59 = vpop.f32.mrb[31].mxu0 }
 0x11f   :  { %v1716_v60 = vmax.f32 %v691_v53, %v707_v55  ;;  %v511_v61 = vadd.f32 %v1644_v22, %v510_v59 }
 0x120   :  { %v710_v63 = vmax.f32 %v516_v58, 0.0 }
 0x121   :  { %v709_v23 = vmax.f32 %v511_v61, 0.0  ;;  %v1173_v2 = vpop.f32.mrb[32].mxu0 }
 0x122   :  { %v1719_v3 = vmax.f32 %v694_v62, %v710_v63  ;;  %v520_v5 = vpop.f32.mrb[33].mxu0  ;;  %v526_v17 = vadd.f32 %v1173_v2, %v1644_v22 }
 0x123   :  { %v1721_v24 = vmax.f32 %v693_v0, %v709_v23  ;;  %v521_v31 = vadd.f32 %v1644_v22, %v520_v5 }
 0x124   :  { %v712_v39 = vmax.f32 %v526_v17, 0.0 }
 0x125   :  { %v1176_v6 = vpop.f32.mrb[34].mxu0  ;;  %v711_v41 = vmax.f32 %v521_v31, 0.0 }
 0x126   :  { %v530_v8 = vpop.f32.mrb[35].mxu0  ;;  %v536_v18 = vadd.f32 %v1176_v6, %v1644_v22 }
 0x127   :  { %v531_v19 = vadd.f32 %v1644_v22, %v530_v8 }
 0x128   :  { %v714_v52 = vmax.f32 %v536_v18, 0.0 }
 0x129   :  { %v1179_v9 = vpop.f32.mrb[36].mxu0  ;;  %v713_v56 = vmax.f32 %v531_v19, 0.0 }
 0x12a   :  { %v540_v10 = vpop.f32.mrb[37].mxu0  ;;  %v546_v53 = vadd.f32 %v1179_v9, %v1644_v22 }
 0x12b   :  { %v541_v58 = vadd.f32 %v1644_v22, %v540_v10 }
 0x12c   :  { %v716_v8 = vmax.f32 %v546_v53, 0.0 }
 0x12d   :  { %v1182_v11 = vpop.f32.mrb[38].mxu0  ;;  %v715_v17 = vmax.f32 %v541_v58, 0.0 }
 0x12e   :  { %v550_v12 = vpop.f32.mrb[39].mxu0  ;;  %v556_v9 = vadd.f32 %v1182_v11, %v1644_v22 }
 0x12f   :  { %v551_v31 = vadd.f32 %v1644_v22, %v550_v12 }
 0x131   :  { %v1185_v13 = vpop.f32.mrb[40].mxu0 }
 0x132   :  { %v1723_v15 = vpop.f32.mrb[41].mxu0  ;;  %v566_v12 = vadd.f32 %v1185_v13, %v1644_v22 }
 0x134   :  { %v720_v13 = vmax.f32 %v566_v12, 0.0 }
 0x135   :  { %v1725_v25 = vpop.f32.mrb[42].mxu0 }
 0x136   :  { %v1727_v27 = vpop.f32.mrb[43].mxu0 }
 0x139   :  { %v1729_v28 = vpop.f32.mrb[44].mxu0 }
 0x13a   :  { %v1731_v29 = vpop.f32.mrb[45].mxu0 }
 0x13d   :  { %v1733_v16 = vpop.f32.mrb[46].mxu0 }
 0x13e   :  { %v1735_v30 = vpop.f32.mrb[47].mxu0 }
 0x141   :  { %v1197_v32 = vpop.f32.mrb[48].mxu0 }
 0x142   :  { %v606_v34 = vadd.f32 %v1197_v32, %v1644_v22  ;;  %v600_v35 = vpop.f32.mrb[49].mxu0 }
 0x143   :  { %v601_v37 = vadd.f32 %v1644_v22, %v600_v35 }
 0x144   :  { %v728_v40 = vmax.f32 %v606_v34, 0.0 }
 0x145   :  { %v727_v43 = vmax.f32 %v601_v37, 0.0  ;;  %v1200_v44 = vpop.f32.mrb[50].mxu0 }
 0x146   :  { %v760_v46 = vmax.f32 %v712_v39, %v728_v40  ;;  %v616_v47 = vadd.f32 %v1200_v44, %v1644_v22  ;;  %v610_v49 = vpop.f32.mrb[51].mxu0  ;;  %v561_v44 = vadd.f32 %v1644_v22, %v1723_v15 }
 0x147   :  { %v759_v50 = vmax.f32 %v711_v41, %v727_v43  ;;  %v611_v20 = vadd.f32 %v1644_v22, %v610_v49  ;;  %v718_v41 = vmax.f32 %v556_v9, 0.0  ;;  %v717_v43 = vmax.f32 %v551_v31, 0.0 }
 0x148   :  { %v776_v21 = vmax.f32 %v1656_v38, %v760_v46  ;;  %v730_v55 = vmax.f32 %v616_v47, 0.0  ;;  %v719_v15 = vmax.f32 %v561_v44, 0.0  ;;  %v581_v9 = vadd.f32 %v1644_v22, %v1731_v29 }
 0x149   :  { %v775_v59 = vmax.f32 %v1659_v42, %v759_v50  ;;  %v729_v61 = vmax.f32 %v611_v20, 0.0  ;;  %v1203_v62 = vpop.f32.mrb[52].mxu0 }
 0x14a   :  { %v762_v63 = vmax.f32 %v714_v52, %v730_v55  ;;  %v626_v0 = vadd.f32 %v1203_v62, %v1644_v22  ;;  %v620_v23 = vpop.f32.mrb[53].mxu0  ;;  %v723_v29 = vmax.f32 %v581_v9, 0.0 }
 0x14b   :  { %v761_v5 = vmax.f32 %v713_v56, %v729_v61  ;;  %v621_v38 = vadd.f32 %v1644_v22, %v620_v23  ;;  %v1263_v6 = vpack.c.bf16 %v776_v21, %v775_v59 }
 0x14c   :  { %v778_v42 = vmax.f32 %v1664_v51, %v762_v63  ;;  %v732_v10 = vmax.f32 %v626_v0, 0.0 }
 0x14d   :  { %v777_v32 = vmax.f32 %v1667_v54, %v761_v5  ;;  %v731_v34 = vmax.f32 %v621_v38, 0.0  ;;  %v1206_v35 = vpop.f32.mrb[54].mxu0  ;;  %1265 = vmatpush3.bf16.xpose.msk.msra.mxu1 %vm1752_vm4, %v1263_v6 }
 0x14e   :  { %v764_v37 = vmax.f32 %v716_v8, %v732_v10  ;;  %v636_v39 = vadd.f32 %v1206_v35, %v1644_v22  ;;  %v630_v18 = vpop.f32.mrb[55].mxu0  ;;  %1266 = vmatprep.subr.bf16.mxu1 %v1325_v7 }
 0x14f   :  { %v1267_v11 = vpack.c.bf16 %v778_v42, %v777_v32  ;;  %v763_v40 = vmax.f32 %v715_v17, %v731_v34  ;;  %v631_v51 = vadd.f32 %v1644_v22, %v630_v18 }
 0x150   :  { %v780_v54 = vmax.f32 %v1675_v1, %v764_v37  ;;  %v734_v19 = vmax.f32 %v636_v39, 0.0  ;;  %v576_v1 = vadd.f32 %v1725_v25, %v1644_v22 }
 0x151   :  { %v779_v46 = vmax.f32 %v1678_v4, %v763_v40  ;;  %v733_v47 = vmax.f32 %v631_v51, 0.0  ;;  %v1209_v49 = vpop.f32.mrb[56].mxu0  ;;  %v571_v4 = vadd.f32 %v1644_v22, %v1727_v27  ;;  %v586_v27 = vadd.f32 %v1729_v28, %v1644_v22 }
 0x152   :  { %v766_v50 = vmax.f32 %v718_v41, %v734_v19  ;;  %v646_v20 = vadd.f32 %v1209_v49, %v1644_v22  ;;  %v640_v52 = vpop.f32.mrb[57].mxu0  ;;  %v722_v38 = vmax.f32 %v576_v1, 0.0 }
 0x153   :  { %v1271_v53 = vpack.c.bf16 %v780_v54, %v779_v46  ;;  %v765_v21 = vmax.f32 %v717_v43, %v733_v47  ;;  %v641_v55 = vadd.f32 %v1644_v22, %v640_v52  ;;  %v721_v8 = vmax.f32 %v571_v4, 0.0 }
 0x154   :  { %v782_v56 = vmax.f32 %v1683_v14, %v766_v50  ;;  %v736_v58 = vmax.f32 %v646_v20, 0.0  ;;  %v724_v28 = vmax.f32 %v586_v27, 0.0 }
 0x155   :  { %v781_v59 = vmax.f32 %v1686_v26, %v765_v21  ;;  %v735_v61 = vmax.f32 %v641_v55, 0.0  ;;  %v1212_v62 = vpop.f32.mrb[58].mxu0  ;;  %1269 = vmatpush3.bf16.xpose.msk.msra.mxu1 %vm1752_vm4, %v1267_v11 }
 0x156   :  { %v768_v63 = vmax.f32 %v720_v13, %v736_v58  ;;  %v656_v0 = vadd.f32 %v1212_v62, %v1644_v22  ;;  %v650_v23 = vpop.f32.mrb[59].mxu0  ;;  %1270 = vmatprep.subr.bf16.mxu1 %v1325_v7 }
 0x157   :  { %v1275_v25 = vpack.c.bf16 %v782_v56, %v781_v59  ;;  %v767_v14 = vmax.f32 %v719_v15, %v735_v61  ;;  %v651_v5 = vadd.f32 %v1644_v22, %v650_v23 }
 0x158   :  { %v784_v26 = vmax.f32 %v1693_v33, %v768_v63  ;;  %v738_v6 = vmax.f32 %v656_v0, 0.0  ;;  %v596_v33 = vadd.f32 %v1733_v16, %v1644_v22 }
 0x159   :  { %v783_v42 = vmax.f32 %v1696_v36, %v767_v14  ;;  %v737_v10 = vmax.f32 %v651_v5, 0.0  ;;  %v1215_v17 = vpop.f32.mrb[60].mxu0  ;;  %v591_v36 = vadd.f32 %v1644_v22, %v1735_v30 }
 0x15a   :  { %v770_v31 = vmax.f32 %v722_v38, %v738_v6  ;;  %v666_v32 = vadd.f32 %v1215_v17, %v1644_v22  ;;  %v660_v34 = vpop.f32.mrb[61].mxu0  ;;  %v726_v44 = vmax.f32 %v596_v33, 0.0 }
 0x15b   :  { %v1279_v35 = vpack.c.bf16 %v784_v26, %v783_v42  ;;  %v769_v37 = vmax.f32 %v721_v8, %v737_v10  ;;  %v661_v39 = vadd.f32 %v1644_v22, %v660_v34 }
 0x15c   :  { %v786_v18 = vmax.f32 %v1703_v45, %v770_v31  ;;  %v740_v11 = vmax.f32 %v666_v32, 0.0 }
 0x15d   :  { %v785_v40 = vmax.f32 %v1706_v48, %v769_v37  ;;  %v739_v51 = vmax.f32 %v661_v39, 0.0  ;;  %v1218_v41 = vpop.f32.mrb[62].mxu0  ;;  %1273 = vmatpush3.bf16.xpose.msk.msra.mxu1 %vm1752_vm4, %v1271_v53  ;;  %v725_v48 = vmax.f32 %v591_v36, 0.0 }
 0x15e   :  { %v772_v12 = vmax.f32 %v724_v28, %v740_v11  ;;  %v676_v54 = vadd.f32 %v1218_v41, %v1644_v22  ;;  %v670_v19 = vpop.f32.mrb[63].mxu0  ;;  %1274 = vmatprep.subr.bf16.mxu1 %v1325_v7 }
 0x15f   :  { %v1283_v16 = vpack.c.bf16 %v786_v18, %v785_v40  ;;  %v771_v45 = vmax.f32 %v723_v29, %v739_v51  ;;  %v671_v43 = vadd.f32 %v1644_v22, %v670_v19 }
 0x160   :  { %v788_v30 = vmax.f32 %v1713_v57, %v772_v12  ;;  %v742_v46 = vmax.f32 %v676_v54, 0.0  ;;  %v791_v57 = vld [vmem:[%s1840_s3] sm:$0x3] }
 0x161   :  { %v787_v47 = vmax.f32 %v1716_v60, %v771_v45  ;;  %v741_v49 = vmax.f32 %v671_v43, 0.0  ;;  %v796_v60 = vpop.permute.xlu0 %795 }
 0x162   :  { %v774_v50 = vmax.f32 %v726_v44, %v742_v46 }
 0x163   :  { %v1287_v20 = vpack.c.bf16 %v788_v30, %v787_v47  ;;  %v773_v52 = vmax.f32 %v725_v48, %v741_v49 }
 0x164   :  { %v790_v53 = vmax.f32 %v1719_v3, %v774_v50 }
 0x165   :  { %v789_v21 = vmax.f32 %v1721_v24, %v773_v52  ;;  %1277 = vmatpush3.bf16.xpose.msk.msra.mxu1 %vm1752_vm4, %v1275_v25 }
 0x166   :  { %1278 = vmatprep.subr.bf16.mxu1 %v1325_v7 }
 0x167   :  { %v1291_v22 = vpack.c.bf16 %v790_v53, %v789_v21 }
 0x16d   :  { %1281 = vmatpush3.bf16.xpose.msk.msra.mxu1 %vm1752_vm4, %v1279_v35 }
 0x16e   :  { %1282 = vmatprep.subr.bf16.mxu1 %v1325_v7 }
 0x175   :  { %1285 = vmatpush3.bf16.xpose.msk.msra.mxu1 %vm1752_vm4, %v1283_v16 }
 0x176   :  { %1286 = vmatprep.subr.bf16.mxu1 %v1325_v7 }
 0x17d   :  { %1289 = vmatpush3.bf16.xpose.msk.msra.mxu1 %vm1752_vm4, %v1287_v20 }
 0x17e   :  { %1290 = vmatprep.subr.bf16.mxu1 %v1325_v7 }
 0x185   :  { %1293 = vmatpush3.bf16.xpose.msk.msra.mxu1 %vm1752_vm4, %v1291_v22 }
 0x18c   :  { %1252 = vmatmul.mubr.msk.f32.vlgmr.msra.gmra.mrb[0].mxu1 %vm798_vm3, %v791_v57 }
 0x25f   :  { %v916_v3 = vpop.f32.mrb[0].mxu1 }
 0x260   :  { %v917_v24 = vadd.f32 %v916_v3, %v796_v60  ;;  %v1253_v55 = vpop.f32.mrb[1].mxu1 }
 0x262   :  { %923 = vrot.lane.b32.xlu0 %v917_v24, %s1329_s29  ;;  %921 = vst.msk [vmem:[#allocation2] sm:$0x1] %vm920_vm5, %v917_v24 }
 0x2d4   :  { %v924_v7 = vpop.permute.xlu0 %923 }
 0x2d5   :  { %927 = vst.msk [vmem:[#allocation2 - $0x1] sm:$0x2] %vm926_vm6, %v924_v7 }
 0x2d6   :  { %928 = vst.msk [vmem:[#allocation2 + $0x1] sm:$0x1] %vm920_vm5, %v924_v7 }
 0x2d7   :  { %929 = vst.msk [vmem:[#allocation2] sm:$0x2] %vm926_vm6, %v917_v24 }
 0x2d8   :  { %1312 = shalt.err (!%p1309_p4)
}
 0x2d9   :  { %s1313_s9 = scalar_lea.hbm %s1842_s5, 32 }
 0x2da   :  { %p1314_p5 = scmp.ne.s32.totalorder %s1842_s5, %s1313_s9  ;;  %p1317_p6 = scmp.lt.u32.totalorder %s1313_s9, %s1842_s5 }
 0x2dc   :  { %p1319_p7 = pnand %p1317_p6, %p1314_p5 }
 0x2de   :  { %1322 = shalt.err (!%p1319_p7)
}
 0x2df   :  { %939 = dma.vmem_to_hbm [thread:$0]  %s937_s6, 32, %s1842_s5, [#allocation3]  }
 0x2e0   :  { %1323 = dma.done.wait [#allocation3], 32  }
 0x2e1   :  { %1324 = vsyncadd [#allocation3], 4294967264 }
 0x2e2   :  { %943 = vsyncpa [#allocation3], 1 }

</bundles_post_ra>
